<compile_context>
chip_gen: v6e
topology: v6e:2x2x1
jax: 0.10.0
libtpu: 0.0.40
codegen_flags: <defaults>
</compile_context>

<pallas_src>
import functools

import jax
import jax.numpy as jnp
from jax.experimental import pallas as pl
from jax.experimental.pallas import tpu as pltpu


def _cc_partials_kernel(x_ref, y_ref, c_ref, out_ref, acc_ref, cnt_ref, *,
                        batch, tile_b, tiles_per_core):
    """Grid = (num_cores, tiles_per_core).

    Axis 0 is "parallel" (megacore sharding on v7x); axis 1 streams this
    core's batch tiles.  acc/cnt (VMEM scratch) persist across axis 1 and are
    re-initialized at i == 0 for every core, so the code is also correct when
    both core-slices run sequentially on a single-TC chip.
    """
    core = pl.program_id(0)
    i = pl.program_id(1)

    @pl.when(i == 0)
    def _init():
        acc_ref[...] = jnp.zeros_like(acc_ref)
        cnt_ref[...] = jnp.zeros_like(cnt_ref)

    # Global (unclamped) tile index.  Overhang tiles (g >= ceil(B/tb), which
    # only appear when the tile count does not split evenly across cores) see
    # rows_left <= 0 and contribute exactly zero.
    g = core * tiles_per_core + i
    rows_left = batch - g * tile_b                # traced int32 scalar

    x = x_ref[...].astype(jnp.float32)            # (TB, D)
    c = c_ref[...].astype(jnp.float32)            # (1, D) -> broadcast over rows
    diff = x - c
    sq = diff * diff                              # (TB, D)

    # Zero out-of-bounds tail rows: their VMEM contents are unspecified (can
    # be NaN/Inf bit patterns) and 0 * NaN would still poison the MXU sums.
    valid_rows = jax.lax.broadcasted_iota(jnp.int32, (tile_b, 1), 0) < rows_left
    sq = jnp.where(valid_rows, sq, 0.0)

    # (8, TB) selection mask: row 0 selects y==1 rows, row 1 selects y==0.
    # The lane validity mask keeps garbage tail labels out of the counts.
    y = y_ref[...]                                # (1, TB) int32, batch on lanes
    row8 = jax.lax.broadcasted_iota(jnp.int32, (8, tile_b), 0)
    lane = jax.lax.broadcasted_iota(jnp.int32, (8, tile_b), 1)
    valid = lane < rows_left
    sel = (((row8 == 0) & (y == 1)) | ((row8 == 1) & (y == 0))) & valid
    mask = jnp.where(sel, 1.0, 0.0).astype(jnp.float32)   # (8, TB)

    # MXU: masked row-sums of sq -> (8, D); counts accumulate with a VPU add.
    acc_ref[...] += jnp.dot(mask, sq, preferred_element_type=jnp.float32)
    cnt_ref[...] += mask

    @pl.when(i == pl.num_programs(1) - 1)
    def _finalize():
        # Per-core partials; the divides / branch select happen in the wrapper
        # so that the dual-core split stays race-free.
        out_ref[0, 0] = jnp.sum(acc_ref[0:1, :])   # sum dist over y==1
        out_ref[0, 1] = jnp.sum(acc_ref[1:2, :])   # sum dist over y==0
        out_ref[0, 2] = jnp.sum(cnt_ref[0:1, :])   # count(y==1)
        out_ref[0, 3] = jnp.sum(cnt_ref[1:2, :])   # count(y==0)


def contrastive_center_loss(x, y, centers, *, lambda_c=1.0,
                            block_rows=None, num_cores=None):
    """x: (B, D) float (f32 or bf16 - pass bf16 through, the kernel upcasts
    on-chip), y: (B,) int labels, centers: (1, D) float.  Returns scalar."""
    B, D = x.shape
    x_isz = jnp.dtype(x.dtype).itemsize

    # ---- generation-aware VMEM budget --------------------------------------
    try:
        vmem_cap = int(pltpu.get_tpu_info().vmem_capacity_bytes)
    except Exception:
        vmem_cap = 64 << 20                       # conservative (v7x-sized)
    vmem_ceiling = (vmem_cap * 3) // 4            # ~96 MiB v5e/v6e, ~48 MiB v7x
    hard_cap = max(vmem_cap - (16 << 20), 32 << 20)

    # ---- core count (v7x has 2 TensorCores and per-TC HBM bandwidth) -------
    if num_cores is None:
        try:
            kind = jax.devices()[0].device_kind.lower()
        except Exception:
            kind = ""
        num_cores = 2 if ("v7" in kind or "tpu7" in kind) else 1

    # ---- tile selection: sized by bytes, constrained by the VMEM ceiling ---
    # Per-row VMEM bytes: double-buffered x block + ~3 tile-sized f32
    # temporaries (upcast / diff / masked sq) + y lanes + count scratch row.
    per_row = 2 * D * x_isz + 3 * D * 4 + 2 * 4 + 8 * 4
    fixed = 2 * D * 4 + 8 * D * 4 + (2 << 20)     # centers + acc scratch + headroom
    tb_vmem = max(8, (vmem_ceiling - fixed) // per_row)
    tb_target = max(8, (8 << 20) // (D * x_isz))  # ~8 MiB of x per buffer
    tb = int(min(tb_vmem, tb_target))
    if block_rows is not None:
        tb = min(tb, int(block_rows))
    if tb >= B:
        tb = B            # single full block: always layout-legal, no padding
    else:
        # Keep tb a multiple of 128: labels are blocked along the LANE axis
        # ((1, tb) blocks), which needs lane-dim % 128 == 0 unless the block
        # spans the whole batch.  At 128-row granularity the minimum x block
        # (128*D*itemsize) fits the v7x budget for any realistic feat_dim.
        # TODO(synk): for very wide features (D >~ 24K on v7x), tile D with a
        # second "arbitrary" grid axis instead of shrinking rows further.
        tb = max(128, (tb // 128) * 128)

    tiles_total = pl.cdiv(B, tb)
    num_cores = max(1, min(int(num_cores), tiles_total))
    tiles_per_core = pl.cdiv(tiles_total, num_cores)

    # Explicit per-core VMEM limit, consistent with the tile derivation above.
    need = per_row * tb + fixed
    vmem_limit = int(min(max(need, 16 << 20), hard_cap))

    y2 = y.reshape(1, B).astype(jnp.int32)

    def x_map(c, i):
        g = c * tiles_per_core + i
        return (jnp.minimum(g, tiles_total - 1), 0)     # clamp overhang tiles

    def y_map(c, i):
        g = c * tiles_per_core + i
        return (0, jnp.minimum(g, tiles_total - 1))

    kernel = functools.partial(_cc_partials_kernel, batch=B, tile_b=tb,
                               tiles_per_core=tiles_per_core)

    # NOTE: if a small tile were ever forced (huge D), pipeline_mode=
    # pl.Buffered(3) on the x BlockSpec would hide DMA issue latency, and the
    # ragged-tail masking could be gated on the last tile; both are left out
    # while the kernel is HBM-bound.
    partials = pl.pallas_call(
        kernel,
        out_shape=jax.ShapeDtypeStruct((num_cores, 4), jnp.float32),
        grid_spec=pltpu.PrefetchScalarGridSpec(
            num_scalar_prefetch=0,
            grid=(num_cores, tiles_per_core),
            in_specs=[
                pl.BlockSpec((tb, D), x_map),               # x tile (streamed)
                pl.BlockSpec((1, tb), y_map),               # labels along lanes
                pl.BlockSpec((1, D), lambda c, i: (0, 0)),  # centers (resident)
            ],
            out_specs=pl.BlockSpec(
                (1, 4), lambda c, i: (c, 0),
                memory_space=pltpu.MemorySpace.SMEM),
            scratch_shapes=[
                pltpu.VMEM((8, D), jnp.float32),    # masked dist partial sums
                pltpu.VMEM((8, tb), jnp.float32),   # masked counts
            ],
        ),
        compiler_params=pltpu.CompilerParams(
            dimension_semantics=("parallel", "arbitrary"),
            vmem_limit_bytes=vmem_limit,
        ),
        cost_estimate=pl.CostEstimate(
            flops=int(20 * B * D),
            transcendentals=0,
            bytes_accessed=int(B * D * x_isz + B * 4 + D * 4 + num_cores * 16),
        ),
    )(x, y2, centers)

    # Combine per-core partials; 4 divides + branch select are trivial in XLA.
    tot = jnp.sum(partials, axis=0)
    sum_pos, sum_neg, cnt_pos, cnt_neg = tot[0], tot[1], tot[2], tot[3]
    intra = sum_pos / cnt_pos          # NaN iff no positives (matches torch 0/0)
    inter = sum_neg / cnt_neg
    lam = jnp.float32(lambda_c)
    return jnp.where(cnt_pos > 0.0,
                     lam * intra / (inter + 1e-6),
                     lam / (inter + 1e-6))


def _reference(x, y, centers, lambda_c=1.0):
    dist = jnp.sum((x.astype(jnp.float32) - centers.astype(jnp.float32)) ** 2,
                   axis=-1)
    pos = (y == 1)
    neg = (y == 0)
    intra = jnp.sum(jnp.where(pos, dist, 0.0)) / jnp.sum(pos)
    inter = jnp.sum(jnp.where(neg, dist, 0.0)) / jnp.sum(neg)
    return jnp.where(jnp.sum(pos) > 0,
                     lambda_c * intra / (inter + 1e-6),
                     lambda_c / (inter + 1e-6))


if __name__ == "__main__":
    feat_dim = 128
    lambda_c = 1.0

    key = jax.random.PRNGKey(0)
    kc, kx1, ky1, kx2, ky2, kx3, ky3 = jax.random.split(key, 7)

    # Deterministic "parameter" init (module does torch.randn(1, feat_dim)).
    centers = jax.random.normal(kc, (1, feat_dim), dtype=jnp.float32)

    def run_case(kx, ky, batch, d, **kw):
        cen = centers if d == feat_dim else jax.random.normal(
            kc, (1, d), dtype=jnp.float32)
        xx = jax.random.normal(kx, (batch, d), dtype=jnp.float32)
        yy = jax.random.bernoulli(ky, 0.5, (batch,)).astype(jnp.int32)
        yy = yy.at[0].set(1).at[1].set(0)          # ensure both classes present
        out = contrastive_center_loss(xx, yy, cen, lambda_c=lambda_c, **kw)
        out = jax.block_until_ready(out)
        ref = _reference(xx, yy, cen, lambda_c)
        assert jnp.allclose(out, ref, rtol=1e-4, atol=1e-5), (kw, out, ref)

    # 1) small batch, single full-batch tile.
    run_case(kx1, ky1, 16, feat_dim)
    # 2) multi-tile, single core, ragged (non-multiple-of-8) tail.
    run_case(kx2, ky2, 203, feat_dim, block_rows=128, num_cores=1)
    # 3) dual-core grid path (correct on single-TC chips too; parallel on v7x).
    run_case(kx3, ky3, 520, 256, block_rows=128, num_cores=2)
    # 4) no-positives branch: loss = lambda_c / (inter + 1e-6).
    x4 = jax.random.normal(kx1, (16, feat_dim), dtype=jnp.float32)
    y4 = jnp.zeros((16,), jnp.int32)
    out4 = jax.block_until_ready(
        contrastive_center_loss(x4, y4, centers, lambda_c=lambda_c))
    ref4 = _reference(x4, y4, centers, lambda_c)
    assert jnp.allclose(out4, ref4, rtol=1e-4, atol=1e-5), (out4, ref4)

    print("KERNEL_OK")
</pallas_src>

<mosaic_0001>
module attributes {stable_mosaic.version = 11 : i64} {
  func.func @_cc_partials_kernel(%arg0: i32, %arg1: i32, %arg2: memref<16x128xf32, #tpu.memory_space<vmem>>, %arg3: memref<1x16xi32, #tpu.memory_space<vmem>>, %arg4: memref<1x128xf32, #tpu.memory_space<vmem>>, %arg5: memref<1x4xf32, #tpu.memory_space<smem>>, %arg6: memref<8x128xf32, #tpu.memory_space<vmem>>, %arg7: memref<8x16xf32, #tpu.memory_space<vmem>>) attributes {dimension_semantics = [#tpu.dimension_semantics<parallel>, #tpu.dimension_semantics<arbitrary>], iteration_bounds = array<i64: 1, 1>, scalar_prefetch = 0 : i64, scratch_operands = 2 : i64, tpu.core_type = #tpu.core_type<tc>, window_params = [{transform_indices = @transform_0, window_bounds = array<i64: 16, 128>}, {transform_indices = @transform_1, window_bounds = array<i64: 1, 16>}, {pipeline_mode = #tpu.pipeline_mode<synchronous>, transform_indices = @transform_2, window_bounds = array<i64: 1, 128>}, {transform_indices = @transform_3, window_bounds = array<i64: 1, 4>}]} {
    %c0_i32 = arith.constant 0 : i32
    %0 = arith.cmpi eq, %arg1, %c0_i32 : i32
    %1 = arith.extui %0 : i1 to i32
    %c0_i32_0 = arith.constant 0 : i32
    %2 = arith.cmpi ne, %1, %c0_i32_0 : i32
    scf.if %2 {
      %cst_24 = arith.constant 0.000000e+00 : f32
      %51 = vector.broadcast %cst_24 : f32 to vector<8x128xf32>
      %c0_25 = arith.constant 0 : index
      %c0_26 = arith.constant 0 : index
      %52 = vector.load %arg6[%c0_25, %c0_26] : memref<8x128xf32, #tpu.memory_space<vmem>>, vector<8x128xf32>
      tpu.vector_store %arg6[%c0_25, %c0_26], %51 {strides = array<i32>} : memref<8x128xf32, #tpu.memory_space<vmem>>, vector<8x128xf32>,
      %cst_27 = arith.constant 0.000000e+00 : f32
      %53 = vector.broadcast %cst_27 : f32 to vector<8x16xf32>
      %c0_28 = arith.constant 0 : index
      %c0_29 = arith.constant 0 : index
      %54 = vector.load %arg7[%c0_28, %c0_29] : memref<8x16xf32, #tpu.memory_space<vmem>>, vector<8x16xf32>
      tpu.vector_store %arg7[%c0_28, %c0_29], %53 {strides = array<i32>} : memref<8x16xf32, #tpu.memory_space<vmem>>, vector<8x16xf32>,
    } else {
    }
    %c1_i32 = arith.constant 1 : i32
    %3 = arith.muli %arg0, %c1_i32 : i32
    %4 = arith.addi %3, %arg1 : i32
    %c16_i32 = arith.constant 16 : i32
    %5 = arith.muli %4, %c16_i32 : i32
    %c16_i32_1 = arith.constant 16 : i32
    %6 = arith.subi %c16_i32_1, %5 : i32
    %c0 = arith.constant 0 : index
    %c0_2 = arith.constant 0 : index
    %7 = vector.load %arg2[%c0, %c0_2] : memref<16x128xf32, #tpu.memory_space<vmem>>, vector<16x128xf32>
    %c0_3 = arith.constant 0 : index
    %c0_4 = arith.constant 0 : index
    %8 = vector.load %arg4[%c0_3, %c0_4] : memref<1x128xf32, #tpu.memory_space<vmem>>, vector<1x128xf32>
    %9 = vector.broadcast %8 : vector<1x128xf32> to vector<16x128xf32>
    %10 = arith.subf %7, %9 : vector<16x128xf32>
    %11 = arith.mulf %10, %10 : vector<16x128xf32>
    %12 = tpu.iota {dimensions = array<i32: 0>} : vector<16x1xi32>
    %13 = vector.broadcast %6 : i32 to vector<16x1xi32>
    %14 = arith.cmpi slt, %12, %13 : vector<16x1xi32>
    %cst = arith.constant 0.000000e+00 : f32
    %15 = vector.shape_cast %14 : vector<16x1xi1> to vector<16x1xi1>
    %16 = vector.broadcast %15 : vector<16x1xi1> to vector<16x128xi1>
    %17 = vector.broadcast %cst : f32 to vector<16x128xf32>
    %18 = arith.select %16, %11, %17 : vector<16x128xi1>, vector<16x128xf32>
    %c0_5 = arith.constant 0 : index
    %c0_6 = arith.constant 0 : index
    %19 = vector.load %arg3[%c0_5, %c0_6] : memref<1x16xi32, #tpu.memory_space<vmem>>, vector<1x16xi32>
    %20 = tpu.iota {dimensions = array<i32: 0>} : vector<8x16xi32>
    %21 = tpu.iota {dimensions = array<i32: 1>} : vector<8x16xi32>
    %22 = vector.broadcast %6 : i32 to vector<8x16xi32>
    %23 = arith.cmpi slt, %21, %22 : vector<8x16xi32>
    %c0_i32_7 = arith.constant 0 : i32
    %24 = vector.broadcast %c0_i32_7 : i32 to vector<8x16xi32>
    %25 = arith.cmpi eq, %20, %24 : vector<8x16xi32>
    %c1_i32_8 = arith.constant 1 : i32
    %26 = vector.broadcast %c1_i32_8 : i32 to vector<1x16xi32>
    %27 = arith.cmpi eq, %19, %26 : vector<1x16xi32>
    %28 = vector.broadcast %27 : vector<1x16xi1> to vector<8x16xi1>
    %29 = arith.andi %25, %28 : vector<8x16xi1>
    %c1_i32_9 = arith.constant 1 : i32
    %30 = vector.broadcast %c1_i32_9 : i32 to vector<8x16xi32>
    %31 = arith.cmpi eq, %20, %30 : vector<8x16xi32>
    %c0_i32_10 = arith.constant 0 : i32
    %32 = vector.broadcast %c0_i32_10 : i32 to vector<1x16xi32>
    %33 = arith.cmpi eq, %19, %32 : vector<1x16xi32>
    %34 = vector.broadcast %33 : vector<1x16xi1> to vector<8x16xi1>
    %35 = arith.andi %31, %34 : vector<8x16xi1>
    %36 = arith.ori %29, %35 : vector<8x16xi1>
    %37 = arith.andi %36, %23 : vector<8x16xi1>
    %cst_11 = arith.constant 1.000000e+00 : f32
    %cst_12 = arith.constant 0.000000e+00 : f32
    %38 = vector.broadcast %cst_11 : f32 to vector<8x16xf32>
    %39 = vector.broadcast %cst_12 : f32 to vector<8x16xf32>
    %40 = arith.select %37, %38, %39 : vector<8x16xi1>, vector<8x16xf32>
    %c0_13 = arith.constant 0 : index
    %c0_14 = arith.constant 0 : index
    %41 = vector.load %arg6[%c0_13, %c0_14] : memref<8x128xf32, #tpu.memory_space<vmem>>, vector<8x128xf32>
    %cst_15 = arith.constant dense<0.000000e+00> : vector<8x128xf32>
    %42 = tpu.matmul %40, %18, %cst_15 {dimension_numbers = #tpu.dot_dimension_numbers<[1], [0], [0], [1], [0, 0, 1, 1], [], []>} : vector<8x16xf32>, vector<16x128xf32>, vector<8x128xf32> -> vector<8x128xf32>
    %43 = arith.addf %41, %42 : vector<8x128xf32>
    %c0_16 = arith.constant 0 : index
    %c0_17 = arith.constant 0 : index
    %44 = vector.load %arg6[%c0_16, %c0_17] : memref<8x128xf32, #tpu.memory_space<vmem>>, vector<8x128xf32>
    tpu.vector_store %arg6[%c0_16, %c0_17], %43 {strides = array<i32>} : memref<8x128xf32, #tpu.memory_space<vmem>>, vector<8x128xf32>,
    %c0_18 = arith.constant 0 : index
    %c0_19 = arith.constant 0 : index
    %45 = vector.load %arg7[%c0_18, %c0_19] : memref<8x16xf32, #tpu.memory_space<vmem>>, vector<8x16xf32>
    %46 = arith.addf %45, %40 : vector<8x16xf32>
    %c0_20 = arith.constant 0 : index
    %c0_21 = arith.constant 0 : index
    %47 = vector.load %arg7[%c0_20, %c0_21] : memref<8x16xf32, #tpu.memory_space<vmem>>, vector<8x16xf32>
    tpu.vector_store %arg7[%c0_20, %c0_21], %46 {strides = array<i32>} : memref<8x16xf32, #tpu.memory_space<vmem>>, vector<8x16xf32>,
    %c0_i32_22 = arith.constant 0 : i32
    %48 = arith.cmpi eq, %arg1, %c0_i32_22 : i32
    %49 = arith.extui %48 : i1 to i32
    %c0_i32_23 = arith.constant 0 : i32
    %50 = arith.cmpi ne, %49, %c0_i32_23 : i32
    scf.if %50 {
      %c0_24 = arith.constant 0 : index
      %c0_25 = arith.constant 0 : index
      %51 = vector.load %arg6[%c0_24, %c0_25] : memref<8x128xf32, #tpu.memory_space<vmem>>, vector<1x128xf32>
      %52 = vector.shape_cast %51 : vector<1x128xf32> to vector<1x1x128xf32>
      %cst_26 = arith.constant dense<0.000000e+00> : vector<1xf32>
      %53 = vector.multi_reduction <add>, %52, %cst_26 [1, 2] : vector<1x1x128xf32> to vector<1xf32>
      %54 = vector.shape_cast %53 : vector<1xf32> to vector<1x1x1xf32>
      %55 = vector.extract %54[0, 0, 0] : f32 from vector<1x1x1xf32>
      %c0_27 = arith.constant 0 : index
      %c0_28 = arith.constant 0 : index
      %56 = memref.load %arg5[%c0_27, %c0_28] : memref<1x4xf32, #tpu.memory_space<smem>>
      memref.store %55, %arg5[%c0_27, %c0_28] : memref<1x4xf32, #tpu.memory_space<smem>>
      %c1 = arith.constant 1 : index
      %c0_29 = arith.constant 0 : index
      %57 = vector.load %arg6[%c1, %c0_29] : memref<8x128xf32, #tpu.memory_space<vmem>>, vector<1x128xf32>
      %58 = vector.shape_cast %57 : vector<1x128xf32> to vector<1x1x128xf32>
      %cst_30 = arith.constant dense<0.000000e+00> : vector<1xf32>
      %59 = vector.multi_reduction <add>, %58, %cst_30 [1, 2] : vector<1x1x128xf32> to vector<1xf32>
      %60 = vector.shape_cast %59 : vector<1xf32> to vector<1x1x1xf32>
      %61 = vector.extract %60[0, 0, 0] : f32 from vector<1x1x1xf32>
      %c0_31 = arith.constant 0 : index
      %c1_32 = arith.constant 1 : index
      %62 = memref.load %arg5[%c0_31, %c1_32] : memref<1x4xf32, #tpu.memory_space<smem>>
      memref.store %61, %arg5[%c0_31, %c1_32] : memref<1x4xf32, #tpu.memory_space<smem>>
      %c0_33 = arith.constant 0 : index
      %c0_34 = arith.constant 0 : index
      %63 = vector.load %arg7[%c0_33, %c0_34] : memref<8x16xf32, #tpu.memory_space<vmem>>, vector<1x16xf32>
      %64 = vector.shape_cast %63 : vector<1x16xf32> to vector<1x1x16xf32>
      %cst_35 = arith.constant dense<0.000000e+00> : vector<1xf32>
      %65 = vector.multi_reduction <add>, %64, %cst_35 [1, 2] : vector<1x1x16xf32> to vector<1xf32>
      %66 = vector.shape_cast %65 : vector<1xf32> to vector<1x1x1xf32>
      %67 = vector.extract %66[0, 0, 0] : f32 from vector<1x1x1xf32>
      %c0_36 = arith.constant 0 : index
      %c2 = arith.constant 2 : index
      %68 = memref.load %arg5[%c0_36, %c2] : memref<1x4xf32, #tpu.memory_space<smem>>
      memref.store %67, %arg5[%c0_36, %c2] : memref<1x4xf32, #tpu.memory_space<smem>>
      %c1_37 = arith.constant 1 : index
      %c0_38 = arith.constant 0 : index
      %69 = vector.load %arg7[%c1_37, %c0_38] : memref<8x16xf32, #tpu.memory_space<vmem>>, vector<1x16xf32>
      %70 = vector.shape_cast %69 : vector<1x16xf32> to vector<1x1x16xf32>
      %cst_39 = arith.constant dense<0.000000e+00> : vector<1xf32>
      %71 = vector.multi_reduction <add>, %70, %cst_39 [1, 2] : vector<1x1x16xf32> to vector<1xf32>
      %72 = vector.shape_cast %71 : vector<1xf32> to vector<1x1x1xf32>
      %73 = vector.extract %72[0, 0, 0] : f32 from vector<1x1x1xf32>
      %c0_40 = arith.constant 0 : index
      %c3 = arith.constant 3 : index
      %74 = memref.load %arg5[%c0_40, %c3] : memref<1x4xf32, #tpu.memory_space<smem>>
      memref.store %73, %arg5[%c0_40, %c3] : memref<1x4xf32, #tpu.memory_space<smem>>
    } else {
    }
    return
  }
  func.func @transform_0(%arg0: i32, %arg1: i32) -> (i32, i32) {
    %c1_i32 = arith.constant 1 : i32
    %0 = arith.muli %arg0, %c1_i32 : i32
    %1 = arith.addi %0, %arg1 : i32
    %c0_i32 = arith.constant 0 : i32
    %2 = arith.minsi %1, %c0_i32 : i32
    %c0_i32_0 = arith.constant 0 : i32
    %c0_i32_1 = arith.constant 0 : i32
    return %2, %c0_i32_0 : i32, i32
  }
  func.func @transform_1(%arg0: i32, %arg1: i32) -> (i32, i32) {
    %c1_i32 = arith.constant 1 : i32
    %0 = arith.muli %arg0, %c1_i32 : i32
    %1 = arith.addi %0, %arg1 : i32
    %c0_i32 = arith.constant 0 : i32
    %2 = arith.minsi %1, %c0_i32 : i32
    %c0_i32_0 = arith.constant 0 : i32
    %c0_i32_1 = arith.constant 0 : i32
    return %c0_i32_0, %2 : i32, i32
  }
  func.func @transform_2(%arg0: i32, %arg1: i32) -> (i32, i32) {
    %c0_i32 = arith.constant 0 : i32
    %c0_i32_0 = arith.constant 0 : i32
    %c0_i32_1 = arith.constant 0 : i32
    return %c0_i32, %c0_i32_0 : i32, i32
  }
  func.func @transform_3(%arg0: i32, %arg1: i32) -> (i32, i32) {
    %c0_i32 = arith.constant 0 : i32
    %c0_i32_0 = arith.constant 0 : i32
    return %arg0, %c0_i32 : i32, i32
  }
}

</mosaic_0001>

<bundles_post_ra>
// kernel: tpu_custom_call.1
= control target key start
LH: loop header
LB: loop body
LE: loop exit
PB: predicated region body
PF: predicated region fallthrough
CT: control target
= control target key end

     0   :  { %8 = vsyncpa [#allocation5], 0  ;;  %s380_s0 = inlined_call_operand.hbm [shape: f32[16,128], index: 0, kind: input, shape index: {}]   ;;  %s381_s1 = inlined_call_operand.vmem [shape: s32[1,16], index: 1, kind: input, shape index: {}]   ;;  %s382_s2 = inlined_call_operand.vmem [shape: f32[1,128], index: 2, kind: input, shape index: {}]   ;;  %s383_s3 = inlined_call_operand.hbm [shape: f32[1,4], index: 3, kind: output, shape index: {}]  }
   0x1   :  { %9 = vsyncpa [#allocation6], 0  ;;  %s338_s12 = smov [#allocation4]  }
   0x2   :  { %s21_s13 = sshll.u32 %s338_s12, 4  ;;  %s22_s13 = int_to_ptr.vmem [resolvable:$true] %s21_s13 }
   0x3   :  { %s314_s14 = scalar_lea.vmem %s22_s13, 256  ;;  %p319_p1 = scmp.lt.s32.totalorder %s22_s13, %s22_s13 }
   0x4   :  { %p315_p0 = scmp.ne.s32.totalorder %s22_s13, %s314_s14  ;;  %p320_p2 = scmp.lt.s32.totalorder %s314_s14, %s314_s14 }
   0x6   :  { %p321_p3 = por %p320_p2, %p319_p1 }
   0x8   :  { %p322_p4 = pnand %p321_p3, %p315_p0 }
   0xa   :  { %325 = shalt.err (!%p322_p4)
}
   0xb   :  { %s339_s15 = smov 128   ;;  %s340_s16 = smov 8  }
   0xc   :  { %27 = dma.hbm_to_vmem [thread:$0]  %s380_s0, 256, %s22_s13, [#allocation5], %s339_s15, %s339_s15, %s340_s16  }
   0xd   :  { %334 = dma.done.wait [#allocation5], 256  }
   0xe   :  { %335 = vsyncadd [#allocation5], 4294967040  ;;  %vm68_vm0 = vcmask 130048   ;;  %v86_v0 = vlaneseq  ;;  %v341_v1 = vmov 0.0   ;;  %vm342_vm1 = vmmov 0   ;;  %v73_v3 = vld [vmem:[#allocation4] sm:$0xff] }
   0xf   :  { %284 = vmatprep.subr.mxu0 %v341_v1  ;;  %288 = vmatprep.mubr.msk.f32.mxu0 %vm342_vm1, %v341_v1  ;;  %69 = vst.msk [vmem:[#allocation3] sm:$0xff] %vm68_vm0, %v341_v1  ;;  %v74_v4 = vld [vmem:[#allocation4 + $0x8] sm:$0xff]  ;;  %v279_v5 = vld [vmem:[%s382_s2] ss:$0 sm:$0xff]  ;;  %v343_v13 = vmov 0   ;;  %vm234_vm13 = vcmask 122880  }
  0x10   :  { %v87_v2 = vshrl.u32 %v86_v0, 7  ;;  %v82_v7 = vsub.f32 %v73_v3, %v279_v5  ;;  %v83_v8 = vsub.f32 %v74_v4, %v279_v5  ;;  %v98_v9 = vld [vmem:[%s381_s1] sm:$0x1]  ;;  %v100_v10 = vand.u32 127, %v86_v0  ;;  %s344_s24 = smov [#allocation7]  }
  0x11   :  { %vm103_vm2 = vcmp.eq.s32.totalorder %v98_v9, 1  ;;  %vm112_vm3 = vcmp.eq.s32.totalorder %v98_v9, 0  ;;  %vm207_vm14 = vcmask 1040384  }
  0x12   :  { %v107_v6 = vsub.s32 0, %v87_v2  ;;  %v85_v11 = vmul.f32 %v83_v8, %v83_v8  ;;  %v84_v12 = vmul.f32 %v82_v7, %v82_v7  ;;  %v104_v14 = vsel %vm103_vm2, 1, %v343_v13 }
  0x13   :  { %v113_v15 = vsel %vm112_vm3, 1, %v343_v13  ;;  %vm102_vm4 = vcmp.eq.s32.totalorder %v87_v2, 0  ;;  %vm111_vm5 = vcmp.eq.s32.totalorder %v87_v2, 1  ;;  %vm101_vm8 = vcmp.lt.s32.totalorder %v100_v10, 16 }
  0x14   :  { %v108_v16 = vrot.slane %v104_v14, %v107_v6  ;;  %v117_v17 = vrot.slane %v113_v15, %v107_v6  ;;  %285 = vmatpush3.msra.mxu0 %v85_v11 }
  0x15   :  { %286 = vmatprep.subr.mxu0 %v341_v1 }
  0x16   :  { %vm109_vm6 = vcmp.eq.s32.totalorder %v108_v16, 1  ;;  %vm118_vm7 = vcmp.eq.s32.totalorder %v117_v17, 1  ;;  %287 = vmatpush3.msra.mxu0 %v84_v12  ;;  %v200_v18 = vld [vmem:[#allocation3] sm:$0xff] }
  0x17   :  { %vm110_vm9 = vmand %vm102_vm4, %vm109_vm6 }
  0x18   :  { %vm119_vm10 = vmand %vm111_vm5, %vm118_vm7 }
  0x19   :  { %vm120_vm11 = vmor %vm110_vm9, %vm119_vm10 }
  0x1a   :  { %vm121_vm12 = vmand %vm120_vm11, %vm101_vm8 }
  0x1b   :  { %v122_v19 = vsel %vm121_vm12, 1.0, %v341_v1 }
  0x1c   :  { %289 = vmatmul.mubr.msk.f32.vlgmr.msra.gmra.mxu0 %vm68_vm0, %v122_v19  ;;  %v201_v20 = vadd.f32 %v200_v18, %v122_v19 }
  0x1e   :  { %202 = vst.msk [vmem:[#allocation3] sm:$0xff] %vm68_vm0, %v201_v20 }
  0x25   :  { %v233_v21 = vld [vmem:[#allocation3] sm:$0x1]  ;;  %v247_v22 = vld [vmem:[#allocation3 + $0x1] sm:$0x1] }
  0x26   :  { %v235_v23 = vsel %vm234_vm13, %v233_v21, 0.0  ;;  %v248_v24 = vsel %vm234_vm13, %v247_v22, 0.0 }
  0x27   :  { %236 = vadd.xlane.f32.xlu1 %v235_v23 }
  0x2b   :  { %249 = vadd.xlane.f32.xlu1 %v248_v24 }
  0xb0   :  { %v237_v31 = vpop.xlane.xlu1 %236 }
  0xb1   :  { %v238_v33 = vrot.slane %v237_v31, 4 }
  0xb3   :  { %v239_v35 = vadd.f32 %v238_v33, %v237_v31 }
  0xb4   :  { %v250_v32 = vpop.xlane.xlu1 %249 }
  0xb5   :  { %v251_v34 = vrot.slane %v250_v32, 4  ;;  %v240_v40 = vrot.slane %v239_v35, 2 }
  0xb7   :  { %v252_v37 = vadd.f32 %v251_v34, %v250_v32  ;;  %v241_v47 = vadd.f32 %v240_v40, %v239_v35 }
  0xb9   :  { %v253_v42 = vrot.slane %v252_v37, 2  ;;  %v242_v53 = vrot.slane %v241_v47, 1 }
  0xbb   :  { %v254_v48 = vadd.f32 %v253_v42, %v252_v37  ;;  %v243_v57 = vadd.f32 %v242_v53, %v241_v47 }
  0xbd   :  { %v255_v55 = vrot.slane %v254_v48, 1 }
  0xbf   :  { %v256_v58 = vadd.f32 %v255_v55, %v254_v48 }
  0xdc   :  { %v194_v25 = vpop.f32.mrf.mxu0 }
  0xdd   :  { %199 = vst [vmem:[#allocation2] sm:$0xff] %v194_v25 }
  0xde   :  { %v290_v26 = vpop.f32.mrf.mxu0 }
  0xe4   :  { %v206_v27 = vld [vmem:[#allocation2] sm:$0x1]  ;;  %v220_v29 = vld [vmem:[#allocation2 + $0x1] sm:$0x1] }
  0xe5   :  { %v208_v28 = vsel %vm207_vm14, %v206_v27, 0.0  ;;  %v221_v30 = vsel %vm207_vm14, %v220_v29, 0.0 }
  0xe6   :  { %209 = vadd.xlane.f32.xlu0 %v208_v28 }
  0xea   :  { %222 = vadd.xlane.f32.xlu0 %v221_v30 }
 0x16f   :  { %v210_v36 = vpop.xlane.xlu0 %209 }
 0x170   :  { %v211_v38 = vrot.slane %v210_v36, 4 }
 0x172   :  { %v212_v39 = vadd.f32 %v211_v38, %v210_v36 }
 0x173   :  { %v223_v41 = vpop.xlane.xlu0 %222 }
 0x174   :  { %v213_v43 = vrot.slane %v212_v39, 2  ;;  %v224_v44 = vrot.slane %v223_v41, 4 }
 0x176   :  { %v225_v45 = vadd.f32 %v224_v44, %v223_v41  ;;  %v214_v46 = vadd.f32 %v213_v43, %v212_v39 }
 0x178   :  { %v226_v49 = vrot.slane %v225_v45, 2  ;;  %v215_v50 = vrot.slane %v214_v46, 1 }
 0x17a   :  { %v227_v51 = vadd.f32 %v226_v49, %v225_v45  ;;  %v216_v52 = vadd.f32 %v215_v50, %v214_v46 }
 0x17c   :  { %291 = vpush %v216_v52  ;;  %v228_v54 = vrot.slane %v227_v51, 1 }
 0x17e   :  { %v229_v56 = vadd.f32 %v228_v54, %v227_v51 }
 0x180   :  { %293 = vpush %v229_v56 }
 0x181   :  { %295 = vpush %v243_v57 }
 0x182   :  { %297 = vpush %v256_v58 }
 0x1ad   :  { %s292_s1 = spop %291 }
 0x1ae   :  { %219 = sst [smem:[#allocation7]] %s292_s1 }
 0x1b1   :  { %s294_s2 = spop %293 }
 0x1b2   :  { %232 = sst [smem:[#allocation7 + $0x1]] %s294_s2  ;;  %s296_s22 = spop %295 }
 0x1b3   :  { %246 = sst [smem:[#allocation7 + $0x2]] %s296_s22  ;;  %s298_s23 = spop %297 }
 0x1b4   :  { %259 = sst [smem:[#allocation7 + $0x3]] %s298_s23 }
 0x1b5   :  { %267 = dma.smem_to_hbm %s344_s24, 16, %s383_s3, [#allocation6]  }
 0x1b6   :  { %336 = dma.done.wait [#allocation6], 16  }
 0x1b7   :  { %337 = vsyncadd [#allocation6], 4294967280 }
 0x1b8   :  { %271 = sfence }
 0x1b9   :  { %272 = vsyncpa [#allocation5], 1 }
 0x1ba   :  { %273 = vsyncpa [#allocation6], 1 }

</bundles_post_ra>
